<compile_context>
chip_gen: v7x
topology: tpu7x:2x2x1
jax: 0.10.0
libtpu: 0.0.40
codegen_flags: <defaults>
</compile_context>

<pallas_src>
import functools

import jax
import jax.numpy as jnp
from jax import lax
from jax.experimental import pallas as pl
from jax.experimental.pallas import tpu as pltpu

LANE = 128   # lane width; final layer is zero-padded to this many output columns
SUB = 128    # rows per inner sub-block (bounds vreg pressure inside a big tile)


def _round_up(n, m):
    return ((n + m - 1) // m) * m


def _choose_tb(batch):
    """Rows of the batch tile processed per grid step.

    * large B: 256/512-row tiles amortize the ~0.35us per-grid-step overhead
      (128-row tiles were step-overhead bound) and are multiples of 256 for v6e.
    * always aim for >=2 grid steps so the "parallel" batch axis can be split
      across v7x's two TensorCores.
    """
    if batch <= 16:
        return _round_up(batch, 8)
    if batch <= 2 * SUB:
        return _round_up(-(-batch // 2), 16)           # 2 steps, 16-row aligned (bf16 tile)
    return min(512, _round_up(-(-batch // 2), 256))    # big tiles, capped, >=2 steps


def _dqn_kernel(x_ref, w1_ref, b1_ref, w2_ref, b2_ref, w3_ref, b3_ref, o_ref,
                *, num_sub, sub):
    """Fused MLP over one (TB, in_dim) batch tile.

    Weights/biases are VMEM-resident (index_map -> (0, 0)). The tile is processed
    in `num_sub` sub-blocks of `sub` rows so TB can be large (grid-step / DMA
    amortization) without blowing up vreg pressure.
    """

    def sub_block(x):
        # Layer 1: f32 x f32 (K = input_dim is tiny, so full precision is ~free).
        h1 = jnp.dot(x, w1_ref[...], preferred_element_type=jnp.float32)
        h1 = jnp.maximum(h1 + b1_ref[...], 0.0)
        # Layer 2: bf16 x bf16 -> f32 accumulate.
        h2 = jnp.dot(h1.astype(jnp.bfloat16), w2_ref[...],
                     preferred_element_type=jnp.float32)
        h2 = jnp.maximum(h2 + b2_ref[...], 0.0)
        # Layer 3: bf16 x bf16 -> f32; output columns zero-padded out to LANE.
        out = jnp.dot(h2.astype(jnp.bfloat16), w3_ref[...],
                      preferred_element_type=jnp.float32)
        return out + b3_ref[...]

    if num_sub == 1:
        o_ref[...] = sub_block(x_ref[...]).astype(o_ref.dtype)
    else:
        def body(j, carry):
            r = pl.multiple_of(j * sub, sub)
            o_ref[pl.ds(r, sub), :] = sub_block(
                x_ref[pl.ds(r, sub), :]).astype(o_ref.dtype)
            return carry

        lax.fori_loop(0, num_sub, body, 0, unroll=True)


def prepare_params(params):
    """One-time parameter prep, hoisted out of the per-call path:
      * zero-pad the last layer from out_dim to LANE columns (lane-dense stores; exact),
      * cast layer-2/3 weights to bf16 (layer 1 stays f32),
      * keep all biases f32 (added to the f32 accumulators).
    """
    hidden = params["w1"].shape[1]
    out_dim = params["w3"].shape[1]
    w3p = jnp.zeros((hidden, LANE), jnp.float32).at[:, :out_dim].set(params["w3"])
    b3p = jnp.zeros((1, LANE), jnp.float32).at[:, :out_dim].set(params["b3"])
    return {
        "w1": params["w1"].astype(jnp.float32),
        "b1": params["b1"].astype(jnp.float32),
        "w2": params["w2"].astype(jnp.bfloat16),
        "b2": params["b2"].astype(jnp.float32),
        "w3": w3p.astype(jnp.bfloat16),
        "b3": b3p,
    }


def dqn_forward(x, prep, out_dim):
    """x: (B, input_dim) float32. prep: output of prepare_params(). Returns (B, out_dim) f32."""
    B, in_dim = x.shape
    hidden = prep["w1"].shape[1]

    TB = _choose_tb(B)
    if TB > SUB:
        assert TB % SUB == 0
        sub, num_sub = SUB, TB // SUB
    else:
        sub, num_sub = TB, 1
    # Last block may be partial: OOB input rows are padded, OOB output rows are
    # masked on writeback, so no wrapper-side jnp.pad is needed.
    grid = (pl.cdiv(B, TB),)

    resident = lambda arr: pl.BlockSpec(arr.shape, lambda i: (0, 0))

    flops = 2 * B * (in_dim * hidden + hidden * hidden + hidden * LANE)
    bytes_accessed = (x.size * 4 + B * LANE * 2            # streamed f32 x + bf16 output
                      + prep["w1"].size * 4 + prep["w2"].size * 2 + prep["w3"].size * 2
                      + (prep["b1"].size + prep["b2"].size + prep["b3"].size) * 4)

    out = pl.pallas_call(
        functools.partial(_dqn_kernel, num_sub=num_sub, sub=sub),
        # bf16 output halves the dominant HBM write stream.
        out_shape=jax.ShapeDtypeStruct((B, LANE), jnp.bfloat16),
        grid_spec=pl.GridSpec(
            grid=grid,
            in_specs=[
                pl.BlockSpec((TB, in_dim), lambda i: (i, 0)),   # x streamed over batch
                resident(prep["w1"]), resident(prep["b1"]),     # VMEM-resident params
                resident(prep["w2"]), resident(prep["b2"]),
                resident(prep["w3"]), resident(prep["b3"]),
            ],
            out_specs=pl.BlockSpec((TB, LANE), lambda i: (i, 0)),
        ),
        compiler_params=pltpu.CompilerParams(dimension_semantics=("parallel",)),
        cost_estimate=pl.CostEstimate(flops=flops, transcendentals=0,
                                      bytes_accessed=bytes_accessed),
    )(x, prep["w1"], prep["b1"], prep["w2"], prep["b2"], prep["w3"], prep["b3"])

    # TODO(synk): consumers that can accept the lane-padded (B, 128) bf16 layout should
    # skip this slice/cast to avoid one extra XLA pass over the output.
    return out[:, :out_dim].astype(jnp.float32)


def init_params(key, input_dim, hidden_dim, output_dim):
    """Deterministic synthetic init (Kaiming-uniform-ish scale like nn.Linear)."""
    ks = jax.random.split(key, 6)

    def linear(kw, kb, fan_in, fan_out):
        bound = 1.0 / jnp.sqrt(fan_in)
        # stored as (in, out) == W^T of the PyTorch (out, in) weight
        w = jax.random.uniform(kw, (fan_in, fan_out), jnp.float32, -bound, bound)
        b = jax.random.uniform(kb, (1, fan_out), jnp.float32, -bound, bound)
        return w, b

    w1, b1 = linear(ks[0], ks[1], input_dim, hidden_dim)
    w2, b2 = linear(ks[2], ks[3], hidden_dim, hidden_dim)
    w3, b3 = linear(ks[4], ks[5], hidden_dim, output_dim)
    return {"w1": w1, "b1": b1, "w2": w2, "b2": b2, "w3": w3, "b3": b3}


def dqn_forward_ref(x, p):
    h1 = jnp.maximum(x @ p["w1"] + p["b1"], 0.0)
    h2 = jnp.maximum(h1 @ p["w2"] + p["b2"], 0.0)
    return h2 @ p["w3"] + p["b3"]


if __name__ == "__main__":
    key = jax.random.PRNGKey(0)
    k_x, k_p, k_x2 = jax.random.split(key, 3)

    batch, input_dim, hidden_dim, output_dim = 8, 16, 128, 4
    params = init_params(k_p, input_dim, hidden_dim, output_dim)
    prep = prepare_params(params)   # one-time prep, reused across calls

    # Small batch: single grid step, TB = 8, no inner loop.
    x = jax.random.normal(k_x, (batch, input_dim), jnp.float32)
    out = jax.block_until_ready(dqn_forward(x, prep, output_dim))
    ref = dqn_forward_ref(x, params)
    assert out.shape == (batch, output_dim)
    # bf16 weights (layers 2/3) + bf16 output -> relaxed tolerance vs. f32 reference.
    assert jnp.allclose(out, ref, atol=5e-2, rtol=5e-2)

    # Non-multiple-of-TB batch: TB=256, 2 grid steps, 2 inner sub-blocks, masked tail.
    big_batch = 260
    x2 = jax.random.normal(k_x2, (big_batch, input_dim), jnp.float32)
    out2 = jax.block_until_ready(dqn_forward(x2, prep, output_dim))
    ref2 = dqn_forward_ref(x2, params)
    assert out2.shape == (big_batch, output_dim)
    assert jnp.allclose(out2, ref2, atol=5e-2, rtol=5e-2)

    # Large batch: TB=512, 3 grid steps, 4 unrolled 128-row sub-blocks per step.
    big_batch2 = 1536
    x3 = jax.random.normal(jax.random.PRNGKey(7), (big_batch2, input_dim), jnp.float32)
    out3 = jax.block_until_ready(dqn_forward(x3, prep, output_dim))
    ref3 = dqn_forward_ref(x3, params)
    assert out3.shape == (big_batch2, output_dim)
    assert jnp.allclose(out3, ref3, atol=5e-2, rtol=5e-2)

    print("KERNEL_OK")
</pallas_src>

<mosaic_0001>
module attributes {stable_mosaic.version = 11 : i64} {
  func.func @_dqn_kernel(%arg0: i32, %arg1: memref<8x16xf32, #tpu.memory_space<vmem>>, %arg2: memref<16x128xf32, #tpu.memory_space<vmem>>, %arg3: memref<1x128xf32, #tpu.memory_space<vmem>>, %arg4: memref<128x128xbf16, #tpu.memory_space<vmem>>, %arg5: memref<1x128xf32, #tpu.memory_space<vmem>>, %arg6: memref<128x128xbf16, #tpu.memory_space<vmem>>, %arg7: memref<1x128xf32, #tpu.memory_space<vmem>>, %arg8: memref<8x128xbf16, #tpu.memory_space<vmem>>) attributes {dimension_semantics = [#tpu.dimension_semantics<parallel>], iteration_bounds = array<i64: 1>, scalar_prefetch = 0 : i64, scratch_operands = 0 : i64, tpu.core_type = #tpu.core_type<tc>, window_params = [{transform_indices = @transform_0, window_bounds = array<i64: 8, 16>}, {pipeline_mode = #tpu.pipeline_mode<synchronous>, transform_indices = @transform_1, window_bounds = array<i64: 16, 128>}, {pipeline_mode = #tpu.pipeline_mode<synchronous>, transform_indices = @transform_2, window_bounds = array<i64: 1, 128>}, {pipeline_mode = #tpu.pipeline_mode<synchronous>, transform_indices = @transform_3, window_bounds = array<i64: 128, 128>}, {pipeline_mode = #tpu.pipeline_mode<synchronous>, transform_indices = @transform_4, window_bounds = array<i64: 1, 128>}, {pipeline_mode = #tpu.pipeline_mode<synchronous>, transform_indices = @transform_5, window_bounds = array<i64: 128, 128>}, {pipeline_mode = #tpu.pipeline_mode<synchronous>, transform_indices = @transform_6, window_bounds = array<i64: 1, 128>}, {transform_indices = @transform_7, window_bounds = array<i64: 8, 128>}]} {
    %c0 = arith.constant 0 : index
    %c0_0 = arith.constant 0 : index
    %0 = vector.load %arg1[%c0, %c0_0] : memref<8x16xf32, #tpu.memory_space<vmem>>, vector<8x16xf32>
    %c0_1 = arith.constant 0 : index
    %c0_2 = arith.constant 0 : index
    %1 = vector.load %arg2[%c0_1, %c0_2] : memref<16x128xf32, #tpu.memory_space<vmem>>, vector<16x128xf32>
    %cst = arith.constant dense<0.000000e+00> : vector<8x128xf32>
    %2 = tpu.matmul %0, %1, %cst {dimension_numbers = #tpu.dot_dimension_numbers<[1], [0], [0], [1], [0, 0, 1, 1], [], []>} : vector<8x16xf32>, vector<16x128xf32>, vector<8x128xf32> -> vector<8x128xf32>
    %c0_3 = arith.constant 0 : index
    %c0_4 = arith.constant 0 : index
    %3 = vector.load %arg3[%c0_3, %c0_4] : memref<1x128xf32, #tpu.memory_space<vmem>>, vector<1x128xf32>
    %4 = vector.broadcast %3 : vector<1x128xf32> to vector<8x128xf32>
    %5 = arith.addf %2, %4 : vector<8x128xf32>
    %cst_5 = arith.constant 0.000000e+00 : f32
    %6 = vector.broadcast %cst_5 : f32 to vector<8x128xf32>
    %7 = arith.maximumf %5, %6 : vector<8x128xf32>
    %8 = arith.truncf %7 : vector<8x128xf32> to vector<8x128xbf16>
    %c0_6 = arith.constant 0 : index
    %c0_7 = arith.constant 0 : index
    %9 = vector.load %arg4[%c0_6, %c0_7] : memref<128x128xbf16, #tpu.memory_space<vmem>>, vector<128x128xbf16>
    %cst_8 = arith.constant dense<0.000000e+00> : vector<8x128xf32>
    %10 = tpu.matmul %8, %9, %cst_8 {dimension_numbers = #tpu.dot_dimension_numbers<[1], [0], [0], [1], [0, 0, 1, 1], [], []>} : vector<8x128xbf16>, vector<128x128xbf16>, vector<8x128xf32> -> vector<8x128xf32>
    %c0_9 = arith.constant 0 : index
    %c0_10 = arith.constant 0 : index
    %11 = vector.load %arg5[%c0_9, %c0_10] : memref<1x128xf32, #tpu.memory_space<vmem>>, vector<1x128xf32>
    %12 = vector.broadcast %11 : vector<1x128xf32> to vector<8x128xf32>
    %13 = arith.addf %10, %12 : vector<8x128xf32>
    %cst_11 = arith.constant 0.000000e+00 : f32
    %14 = vector.broadcast %cst_11 : f32 to vector<8x128xf32>
    %15 = arith.maximumf %13, %14 : vector<8x128xf32>
    %16 = arith.truncf %15 : vector<8x128xf32> to vector<8x128xbf16>
    %c0_12 = arith.constant 0 : index
    %c0_13 = arith.constant 0 : index
    %17 = vector.load %arg6[%c0_12, %c0_13] : memref<128x128xbf16, #tpu.memory_space<vmem>>, vector<128x128xbf16>
    %cst_14 = arith.constant dense<0.000000e+00> : vector<8x128xf32>
    %18 = tpu.matmul %16, %17, %cst_14 {dimension_numbers = #tpu.dot_dimension_numbers<[1], [0], [0], [1], [0, 0, 1, 1], [], []>} : vector<8x128xbf16>, vector<128x128xbf16>, vector<8x128xf32> -> vector<8x128xf32>
    %c0_15 = arith.constant 0 : index
    %c0_16 = arith.constant 0 : index
    %19 = vector.load %arg7[%c0_15, %c0_16] : memref<1x128xf32, #tpu.memory_space<vmem>>, vector<1x128xf32>
    %20 = vector.broadcast %19 : vector<1x128xf32> to vector<8x128xf32>
    %21 = arith.addf %18, %20 : vector<8x128xf32>
    %22 = arith.truncf %21 : vector<8x128xf32> to vector<8x128xbf16>
    %c0_17 = arith.constant 0 : index
    %c0_18 = arith.constant 0 : index
    %23 = vector.load %arg8[%c0_17, %c0_18] : memref<8x128xbf16, #tpu.memory_space<vmem>>, vector<8x128xbf16>
    tpu.vector_store %arg8[%c0_17, %c0_18], %22 {strides = array<i32>} : memref<8x128xbf16, #tpu.memory_space<vmem>>, vector<8x128xbf16>,
    return
  }
  func.func @transform_0(%arg0: i32) -> (i32, i32) {
    %c0_i32 = arith.constant 0 : i32
    %c0_i32_0 = arith.constant 0 : i32
    return %arg0, %c0_i32 : i32, i32
  }
  func.func @transform_1(%arg0: i32) -> (i32, i32) {
    %c0_i32 = arith.constant 0 : i32
    %c0_i32_0 = arith.constant 0 : i32
    %c0_i32_1 = arith.constant 0 : i32
    return %c0_i32, %c0_i32_0 : i32, i32
  }
  func.func @transform_2(%arg0: i32) -> (i32, i32) {
    %c0_i32 = arith.constant 0 : i32
    %c0_i32_0 = arith.constant 0 : i32
    %c0_i32_1 = arith.constant 0 : i32
    return %c0_i32, %c0_i32_0 : i32, i32
  }
  func.func @transform_3(%arg0: i32) -> (i32, i32) {
    %c0_i32 = arith.constant 0 : i32
    %c0_i32_0 = arith.constant 0 : i32
    %c0_i32_1 = arith.constant 0 : i32
    return %c0_i32, %c0_i32_0 : i32, i32
  }
  func.func @transform_4(%arg0: i32) -> (i32, i32) {
    %c0_i32 = arith.constant 0 : i32
    %c0_i32_0 = arith.constant 0 : i32
    %c0_i32_1 = arith.constant 0 : i32
    return %c0_i32, %c0_i32_0 : i32, i32
  }
  func.func @transform_5(%arg0: i32) -> (i32, i32) {
    %c0_i32 = arith.constant 0 : i32
    %c0_i32_0 = arith.constant 0 : i32
    %c0_i32_1 = arith.constant 0 : i32
    return %c0_i32, %c0_i32_0 : i32, i32
  }
  func.func @transform_6(%arg0: i32) -> (i32, i32) {
    %c0_i32 = arith.constant 0 : i32
    %c0_i32_0 = arith.constant 0 : i32
    %c0_i32_1 = arith.constant 0 : i32
    return %c0_i32, %c0_i32_0 : i32, i32
  }
  func.func @transform_7(%arg0: i32) -> (i32, i32) {
    %c0_i32 = arith.constant 0 : i32
    %c0_i32_0 = arith.constant 0 : i32
    return %arg0, %c0_i32 : i32, i32
  }
}

</mosaic_0001>

<bundles_post_ra>
// kernel: tpu_custom_call.1
= control target key start
LH: loop header
LB: loop body
LE: loop exit
PB: predicated region body
PF: predicated region fallthrough
CT: control target
= control target key end

     0   :  { %12 = vsyncpa [#allocation3], 0  ;;  %s771_s0 = inlined_call_operand.hbm [shape: f32[8,16], index: 0, kind: input, shape index: {}]   ;;  %s772_s1 = inlined_call_operand.hbm [shape: f32[16,128], index: 1, kind: input, shape index: {}]   ;;  %s773_s2 = inlined_call_operand.vmem [shape: f32[1,128], index: 2, kind: input, shape index: {}]   ;;  %s774_s3 = inlined_call_operand.hbm [shape: bf16[128,128], index: 3, kind: input, shape index: {}]   ;;  %s775_s4 = inlined_call_operand.vmem [shape: f32[1,128], index: 4, kind: input, shape index: {}]   ;;  %s776_s5 = inlined_call_operand.hbm [shape: bf16[128,128], index: 5, kind: input, shape index: {}]   ;;  %s777_s6 = inlined_call_operand.vmem [shape: f32[1,128], index: 6, kind: input, shape index: {}]   ;;  %s778_s7 = inlined_call_operand.hbm [shape: bf16[8,128], index: 7, kind: output, shape index: {}]  }
   0x1   :  { %13 = vsyncpa [#allocation6], 0 }
   0x2   :  { %14 = vsyncpa [#allocation9], 0 }
   0x3   :  { %15 = vsyncpa [#allocation4], 0  ;;  %s647_s24 = smov [#allocation5]   ;;  %s529_s28 = scalar_lea.hbm %s772_s1, 256 }
   0x4   :  { %s31_s25 = sshll.u32 %s647_s24, 4  ;;  %p530_p0 = scmp.ne.s32.totalorder %s772_s1, %s529_s28  ;;  %s32_s25 = int_to_ptr.vmem [resolvable:$true] %s31_s25 }
   0x5   :  { %p533_p1 = scmp.lt.u32.totalorder %s529_s28, %s772_s1 }
   0x7   :  { %p535_p2 = pnand %p533_p1, %p530_p0 }
   0x9   :  { %538 = shalt.err (!%p535_p2)
}
   0xa   :  { %s539_s10 = scalar_lea.vmem %s32_s25, 256  ;;  %p544_p4 = scmp.lt.s32.totalorder %s32_s25, %s32_s25 }
   0xb   :  { %p540_p3 = scmp.ne.s32.totalorder %s32_s25, %s539_s10  ;;  %p545_p5 = scmp.lt.s32.totalorder %s539_s10, %s539_s10 }
   0xd   :  { %p546_p6 = por %p545_p5, %p544_p4 }
   0xf   :  { %p547_p7 = pnand %p546_p6, %p540_p3 }
  0x11   :  { %550 = shalt.err (!%p547_p7)
}
  0x12   :  { %s648_s11 = smov 128   ;;  %s649_s12 = smov 8  }
  0x13   :  { %37 = dma.hbm_to_vmem [thread:$0]  %s772_s1, 256, %s32_s25, [#allocation6], %s648_s11, %s648_s11, %s649_s12  }
  0x14   :  { %s650_s15 = smov [#allocation2]   ;;  %s651_s17 = smov [#allocation7]  }
  0x15   :  { %s22_s16 = sshll.u32 %s650_s15, 4  ;;  %s45_s18 = sshll.u32 %s651_s17, 4  ;;  %s23_s16 = int_to_ptr.vmem [resolvable:$true] %s22_s16  ;;  %s46_s18 = int_to_ptr.vmem [resolvable:$true] %s45_s18 }
  0x16   :  { %s551_s21 = scalar_lea.hbm %s771_s0, 128 }
  0x17   :  { %p552_p8 = scmp.ne.s32.totalorder %s771_s0, %s551_s21  ;;  %p555_p9 = scmp.lt.u32.totalorder %s551_s21, %s771_s0 }
  0x19   :  { %p557_p10 = pnand %p555_p9, %p552_p8 }
  0x1b   :  { %560 = shalt.err (!%p557_p10)
}
  0x1c   :  { %s561_s1 = scalar_lea.vmem %s23_s16, 128  ;;  %p566_p12 = scmp.lt.s32.totalorder %s23_s16, %s23_s16 }
  0x1d   :  { %p562_p11 = scmp.ne.s32.totalorder %s23_s16, %s561_s1  ;;  %p567_p13 = scmp.lt.s32.totalorder %s561_s1, %s561_s1 }
  0x1f   :  { %p568_p0 = por %p567_p13, %p566_p12 }
  0x21   :  { %p569_p1 = pnand %p568_p0, %p562_p11 }
  0x23   :  { %572 = shalt.err (!%p569_p1)
}
  0x24   :  { %25 = dma.hbm_to_vmem [thread:$0]  %s771_s0, 128, %s23_s16, [#allocation3]  }
  0x25   :  { %s573_s30 = scalar_lea.hbm %s774_s3, 1024 }
  0x26   :  { %p574_p2 = scmp.ne.s32.totalorder %s774_s3, %s573_s30  ;;  %p577_p3 = scmp.lt.u32.totalorder %s573_s30, %s774_s3 }
  0x28   :  { %p579_p4 = pnand %p577_p3, %p574_p2 }
  0x2a   :  { %582 = shalt.err (!%p579_p4)
}
  0x2b   :  { %s583_s12 = scalar_lea.vmem %s46_s18, 1024  ;;  %p588_p6 = scmp.lt.s32.totalorder %s46_s18, %s46_s18 }
  0x2c   :  { %p584_p5 = scmp.ne.s32.totalorder %s46_s18, %s583_s12  ;;  %p589_p7 = scmp.lt.s32.totalorder %s583_s12, %s583_s12 }
  0x2e   :  { %p590_p8 = por %p589_p7, %p588_p6 }
  0x30   :  { %p591_p9 = pnand %p590_p8, %p584_p5 }
  0x32   :  { %594 = shalt.err (!%p591_p9)
}
  0x33   :  { %s652_s0 = smov 64   ;;  %s653_s13 = smov 4  }
  0x34   :  { %51 = dma.hbm_to_vmem [thread:$0]  %s774_s3, 1024, %s46_s18, [#allocation6], %s652_s0, %s652_s0, %s653_s13  }
  0x35   :  { %s654_s16 = smov [#allocation8]   ;;  %s595_s21 = scalar_lea.hbm %s776_s5, 1024 }
  0x36   :  { %s59_s17 = sshll.u32 %s654_s16, 4  ;;  %p596_p10 = scmp.ne.s32.totalorder %s776_s5, %s595_s21  ;;  %s60_s17 = int_to_ptr.vmem [resolvable:$true] %s59_s17 }
  0x37   :  { %p599_p11 = scmp.lt.u32.totalorder %s595_s21, %s776_s5 }
  0x39   :  { %p601_p12 = pnand %p599_p11, %p596_p10 }
  0x3b   :  { %604 = shalt.err (!%p601_p12)
}
  0x3c   :  { %s605_s1 = scalar_lea.vmem %s60_s17, 1024  ;;  %p610_p0 = scmp.lt.s32.totalorder %s60_s17, %s60_s17 }
  0x3d   :  { %p606_p13 = scmp.ne.s32.totalorder %s60_s17, %s605_s1  ;;  %p611_p1 = scmp.lt.s32.totalorder %s605_s1, %s605_s1 }
  0x3f   :  { %p612_p2 = por %p611_p1, %p610_p0 }
  0x41   :  { %p613_p3 = pnand %p612_p2, %p606_p13 }
  0x43   :  { %616 = shalt.err (!%p613_p3)
}
  0x44   :  { %65 = dma.hbm_to_vmem [thread:$0]  %s776_s5, 1024, %s60_s17, [#allocation9], %s652_s0, %s652_s0, %s653_s13  }
  0x45   :  { %639 = dma.done.wait [#allocation3], 128  }
  0x46   :  { %640 = vsyncadd [#allocation3], 4294967168 }
  0x47   :  { %641 = dma.done.wait [#allocation6], 1280  }
  0x48   :  { %642 = vsyncadd [#allocation6], 4294966016 }
  0x49   :  { %643 = dma.done.wait [#allocation9], 1024  }
  0x4a   :  { %644 = vsyncadd [#allocation9], 4294966272  ;;  %v655_v0 = vmov 0.0|0.0   ;;  %vm656_vm0 = vmmov 0   ;;  %v657_v1 = vmov 0.0   ;;  %v82_v2 = vld [vmem:[#allocation5] sm:$0xff] }
  0x4b   :  { %498 = vmatprep.subr.bf16.mxu0 %v655_v0  ;;  %455 = vmatprep.mubr.msk.f32.mxu0 %vm656_vm0, %v657_v1  ;;  %v83_v3 = vld [vmem:[#allocation5 + $0x8] sm:$0xff]  ;;  %v513_v5 = vld [vmem:[#allocation7] sm:$0xff]   ;;  %v81_v6 = vld [vmem:[#allocation2] sm:$0xff]  ;;  %vm91_vm1 = vcmask 130048   ;;  %s658_s30 = smov [#allocation10]  }
  0x4c   :  { %458 = vmatprep.subr.bf16.mxu1 %v657_v1  ;;  %474 = vmatprep.mubr.msk.bf16.mxu1 %vm656_vm0, %v657_v1  ;;  %v499_v4 = vpack.c.bf16 %v83_v3, %v82_v2  ;;  %v514_v7 = vld [vmem:[#allocation7 + $0x8] sm:$0xff]   ;;  %v515_v8 = vld [vmem:[#allocation7 + $0x10] sm:$0xff]   ;;  %v516_v9 = vld [vmem:[#allocation7 + $0x18] sm:$0xff]   ;;  %s399_s8 = sshll.u32 %s658_s30, 4  ;;  %s400_s8 = int_to_ptr.vmem [resolvable:$true] %s399_s8 }
  0x4d   :  { %459 = vmatpush3.bf16.msra.mxu1 %v513_v5  ;;  %v517_v10 = vld [vmem:[#allocation7 + $0x20] sm:$0xff]   ;;  %v518_v11 = vld [vmem:[#allocation7 + $0x28] sm:$0xff]   ;;  %v519_v12 = vld [vmem:[#allocation7 + $0x30] sm:$0xff]   ;;  %p622_p5 = scmp.lt.s32.totalorder %s400_s8, %s400_s8 }
  0x4e   :  { %500 = vmatpush3.bf16.msra.mxu0 %v499_v4  ;;  %460 = vmatprep.subr.bf16.mxu1 %v657_v1  ;;  %v520_v13 = vld [vmem:[#allocation7 + $0x38] sm:$0xff]   ;;  %v521_v14 = vld [vmem:[#allocation8] sm:$0xff]   ;;  %v522_v15 = vld [vmem:[#allocation8 + $0x8] sm:$0xff]  }
  0x4f   :  { %478 = vmatprep.subr.bf16.mxu0 %v657_v1  ;;  %v523_v16 = vld [vmem:[#allocation8 + $0x10] sm:$0xff]   ;;  %v524_v17 = vld [vmem:[#allocation8 + $0x18] sm:$0xff]   ;;  %v525_v18 = vld [vmem:[#allocation8 + $0x20] sm:$0xff]  }
  0x50   :  { %v526_v19 = vld [vmem:[#allocation8 + $0x28] sm:$0xff]   ;;  %v527_v26 = vld [vmem:[#allocation8 + $0x30] sm:$0xff]   ;;  %v528_v27 = vld [vmem:[#allocation8 + $0x38] sm:$0xff]  }
  0x51   :  { %456 = vmatmul.mubr.msk.f32.vlgmr.msra.gmra.mrb[0].mxu0 %vm91_vm1, %v81_v6  ;;  %461 = vmatpush3.bf16.msra.mxu1 %v514_v7  ;;  %v410_v20 = vld [vmem:[%s773_s2] ss:$0 sm:$0xff] }
  0x52   :  { %494 = vmatprep.mubr.msk.bf16.mxu0 %vm656_vm0, %v657_v1  ;;  %462 = vmatprep.subr.bf16.mxu1 %v657_v1  ;;  %v412_v28 = vld [vmem:[%s775_s4] ss:$0 sm:$0xff]  ;;  %s617_s4 = scalar_lea.vmem %s400_s8, 64 }
  0x53   :  { %479 = vmatpush3.bf16.msra.mxu0 %v521_v14  ;;  %v421_v36 = vld [vmem:[%s777_s6] ss:$0 sm:$0xff]  ;;  %p618_p4 = scmp.ne.s32.totalorder %s400_s8, %s617_s4  ;;  %p623_p6 = scmp.lt.s32.totalorder %s617_s4, %s617_s4 }
  0x54   :  { %480 = vmatprep.subr.bf16.mxu0 %v657_v1 }
  0x55   :  { %463 = vmatpush3.bf16.msra.mxu1 %v515_v8  ;;  %p624_p7 = por %p623_p6, %p622_p5 }
  0x56   :  { %464 = vmatprep.subr.bf16.mxu1 %v657_v1 }
  0x57   :  { %481 = vmatpush3.bf16.msra.mxu0 %v522_v15  ;;  %p625_p8 = pnand %p624_p7, %p618_p4 }
  0x58   :  { %482 = vmatprep.subr.bf16.mxu0 %v657_v1 }
  0x59   :  { %465 = vmatpush3.bf16.msra.mxu1 %v516_v9 }
  0x5a   :  { %466 = vmatprep.subr.bf16.mxu1 %v657_v1 }
  0x5b   :  { %483 = vmatpush3.bf16.msra.mxu0 %v523_v16 }
  0x5c   :  { %484 = vmatprep.subr.bf16.mxu0 %v657_v1 }
  0x5d   :  { %467 = vmatpush3.bf16.msra.mxu1 %v517_v10 }
  0x5e   :  { %468 = vmatprep.subr.bf16.mxu1 %v657_v1 }
  0x5f   :  { %485 = vmatpush3.bf16.msra.mxu0 %v524_v17 }
  0x60   :  { %486 = vmatprep.subr.bf16.mxu0 %v657_v1 }
  0x61   :  { %469 = vmatpush3.bf16.msra.mxu1 %v518_v11 }
  0x62   :  { %470 = vmatprep.subr.bf16.mxu1 %v657_v1 }
  0x63   :  { %487 = vmatpush3.bf16.msra.mxu0 %v525_v18 }
  0x64   :  { %488 = vmatprep.subr.bf16.mxu0 %v657_v1 }
  0x65   :  { %471 = vmatpush3.bf16.msra.mxu1 %v519_v12 }
  0x66   :  { %472 = vmatprep.subr.bf16.mxu1 %v657_v1 }
  0x67   :  { %489 = vmatpush3.bf16.msra.mxu0 %v526_v19 }
  0x68   :  { %490 = vmatprep.subr.bf16.mxu0 %v657_v1 }
  0x69   :  { %473 = vmatpush3.bf16.msra.mxu1 %v520_v13 }
  0x6b   :  { %491 = vmatpush3.bf16.msra.mxu0 %v527_v26 }
  0x6c   :  { %492 = vmatprep.subr.bf16.mxu0 %v657_v1 }
  0x6f   :  { %493 = vmatpush3.bf16.msra.mxu0 %v528_v27 }
 0x124   :  { %v161_v21 = vpop.f32.mrb[0].mxu0 }
 0x125   :  { %v162_v22 = vadd.f32 %v410_v20, %v161_v21  ;;  %v457_v23 = vpop.f32.mrb[1].mxu0 }
 0x127   :  { %v165_v24 = vmax.f32 %v162_v22, 0.0 }
 0x129   :  { %v166_v25 = vpack.c.bf16 %v165_v24, %v165_v24 }
 0x12b   :  { %475 = vmatmul.mubr.bf16.vlgmr.msra.gmra.mrb[0].mxu1 %v166_v25 }
 0x1fe   :  { %v272_v29 = vpop.f32.mrb[0].mxu1 }
 0x1ff   :  { %v273_v30 = vadd.f32 %v412_v28, %v272_v29  ;;  %v476_v31 = vpop.f32.mrb[1].mxu1 }
 0x200   :  { %v275_v32 = vpop.f32.mrb[2].mxu1 }
 0x201   :  { %v278_v33 = vmax.f32 %v273_v30, 0.0  ;;  %v477_v34 = vpop.f32.mrb[3].mxu1 }
 0x203   :  { %v279_v35 = vpack.c.bf16 %v278_v33, %v278_v33 }
 0x205   :  { %495 = vmatmul.mubr.bf16.vlgmr.msra.gmra.mrb[4].mxu0 %v279_v35 }
 0x2d8   :  { %v385_v37 = vpop.f32.mrb[4].mxu0 }
 0x2d9   :  { %v386_v38 = vadd.f32 %v421_v36, %v385_v37  ;;  %v496_v39 = vpop.f32.mrb[5].mxu0 }
 0x2da   :  { %v388_v40 = vpop.f32.mrb[6].mxu0 }
 0x2db   :  { %v391_v41 = vpack.c.bf16 %v386_v38, %v386_v38  ;;  %v497_v42 = vpop.f32.mrb[7].mxu0 }
 0x2dd   :  { %392 = vst [vmem:[#allocation10] sm:$0xf] %v391_v41 }
 0x2de   :  { %628 = shalt.err (!%p625_p8)
}
 0x2df   :  { %s629_s6 = scalar_lea.hbm %s778_s7, 64 }
 0x2e0   :  { %p630_p9 = scmp.ne.s32.totalorder %s778_s7, %s629_s6  ;;  %p633_p10 = scmp.lt.u32.totalorder %s629_s6, %s778_s7 }
 0x2e2   :  { %p635_p11 = pnand %p633_p10, %p630_p9 }
 0x2e4   :  { %638 = shalt.err (!%p635_p11)
}
 0x2e5   :  { %402 = dma.vmem_to_hbm [thread:$0]  %s400_s8, 64, %s778_s7, [#allocation4]  }
 0x2e6   :  { %645 = dma.done.wait [#allocation4], 64  }
 0x2e7   :  { %646 = vsyncadd [#allocation4], 4294967232 }
 0x2e8   :  { %406 = vsyncpa [#allocation3], 1 }
 0x2e9   :  { %407 = vsyncpa [#allocation6], 1 }
 0x2ea   :  { %408 = vsyncpa [#allocation9], 1 }
 0x2eb   :  { %409 = vsyncpa [#allocation4], 1 }

</bundles_post_ra>
